<compile_context>
chip_gen: v7x
topology: tpu7x:2x2x1
jax: 0.10.0
libtpu: 0.0.40
codegen_flags: <defaults>
</compile_context>

<pallas_src>
import functools

import jax
import jax.numpy as jnp
from jax.experimental import pallas as pl
from jax.experimental.pallas import tpu as pltpu

LANE = 128  # TPU lane width


def _round_up(a: int, m: int) -> int:
    return (a + m - 1) // m * m


def _leaky_relu(x, negative_slope):
    return jnp.where(x >= 0, x, negative_slope * x)


def action_estimator_kernel(
    x_ref,        # [TB, input_dim]           (f32)
    w1_ref,       # [input_dim, hid_p]        (bf16, input affine folded in)
    b1_ref,       # [1, hid_p]                (f32)
    wh_ref,       # [depth-1, hid_p, hid_p]   (bf16)
    bh_ref,       # [depth-1, 1, hid_p]       (f32)
    wp_ref,       # [hid_p, hid_p]            (bf16)
    bp_ref,       # [1, hid_p]                (f32)
    wl_ref,       # [hid_p, out_p]            (bf16, tanh scale folded in)
    bl_ref,       # [1, out_p]                (f32)
    o_ref,        # [TB, out_p]
    *,
    depth: int,
    negative_slope: float,
    compute_dtype,
):
    # fc1 (input affine already folded into w1/b1) + leaky_relu.
    # Dot operands in bf16 (MXU-native), accumulation + elementwise math in f32.
    x = x_ref[...].astype(compute_dtype)
    h = jnp.dot(x, w1_ref[...], preferred_element_type=jnp.float32) + b1_ref[...]
    h = _leaky_relu(h, negative_slope)

    # hidden layers: Linear -> dropout(identity) -> leaky_relu
    for i in range(depth - 1):
        h = jnp.dot(h.astype(compute_dtype), wh_ref[i],
                    preferred_element_type=jnp.float32) + bh_ref[i]
        h = _leaky_relu(h, negative_slope)

    # fc_prelast -> dropout(identity) -> leaky_relu
    h = jnp.dot(h.astype(compute_dtype), wp_ref[...],
                preferred_element_type=jnp.float32) + bp_ref[...]
    h = _leaky_relu(h, negative_slope)

    # fc_last (scale folded in) -> 0.5 + 0.7 * tanh(y)
    y = jnp.dot(h.astype(compute_dtype), wl_ref[...],
                preferred_element_type=jnp.float32) + bl_ref[...]
    o_ref[...] = (0.5 + 0.7 * jnp.tanh(y)).astype(o_ref.dtype)


def prepare_params(params, *, scale: float = 1.5, lane: int = LANE,
                   compute_dtype=jnp.bfloat16):
    """Fold the input affine + tanh scale into adjacent weights, zero-pad hidden /
    output widths to a lane-dense multiple of 128 (numerically exact), and store
    matmul weights in `compute_dtype` (bf16: ~3x MXU throughput, half the
    DMA / resident VMEM). Biases stay f32 (elementwise math is f32)."""
    in_dim, hid = params["w1"].shape
    out_dim = params["wl"].shape[1]
    n_hidden = params["wh"].shape[0]
    # NOTE: for hidden <= 128 a 128 pad is right on all generations; if hidden ever
    # exceeds 128, pad to 256 on v6e/v7x (2x256x256 MXU) and 128 on v5e.
    hid_p = _round_up(hid, lane)
    out_p = _round_up(out_dim, lane)

    def pad_to(a, shape):
        pads = [(0, t - s) for s, t in zip(a.shape, shape)]
        return jnp.pad(a, pads)

    # fold  y = (4x - 2) @ w1 + b1  ==  x @ (4 w1) + (b1 - 2 * sum(w1, axis=0))
    w1 = 4.0 * params["w1"]
    b1 = params["b1"] - 2.0 * jnp.sum(params["w1"], axis=0, keepdims=True)
    # fold  tanh(y * scale)  ==  tanh(x @ (scale wl) + scale bl)
    wl = scale * params["wl"]
    bl = scale * params["bl"]

    return dict(
        w1=pad_to(w1, (in_dim, hid_p)).astype(compute_dtype),
        b1=pad_to(b1, (1, hid_p)).astype(jnp.float32),
        wh=pad_to(params["wh"], (n_hidden, hid_p, hid_p)).astype(compute_dtype),
        bh=pad_to(params["bh"], (n_hidden, 1, hid_p)).astype(jnp.float32),
        wp=pad_to(params["wp"], (hid_p, hid_p)).astype(compute_dtype),
        bp=pad_to(params["bp"], (1, hid_p)).astype(jnp.float32),
        wl=pad_to(wl, (hid_p, out_p)).astype(compute_dtype),
        bl=pad_to(bl, (1, out_p)).astype(jnp.float32),
    )


def _xla_forward(x, prep, *, out_dim: int, depth: int, negative_slope: float):
    """Plain-XLA fallback for tiny batches (fixed Pallas call/DMA overhead dominates)."""
    f32 = jnp.float32
    h = x.astype(f32) @ prep["w1"].astype(f32) + prep["b1"]
    h = _leaky_relu(h, negative_slope)
    for i in range(depth - 1):
        h = h @ prep["wh"][i].astype(f32) + prep["bh"][i]
        h = _leaky_relu(h, negative_slope)
    h = h @ prep["wp"].astype(f32) + prep["bp"]
    h = _leaky_relu(h, negative_slope)
    y = h @ prep["wl"].astype(f32) + prep["bl"]
    return (0.5 + 0.7 * jnp.tanh(y))[:, :out_dim]


def action_estimator_forward(
    x,
    prep,
    *,
    out_dim: int,
    depth: int = 4,
    negative_slope: float = 0.01,
    block_b: int = 1024,
    out_dtype=jnp.float32,
    return_padded: bool = False,
    xla_fallback_below: int = 0,
):
    """x: [B, input_dim] float32. prep: output of prepare_params (folded + padded)."""
    B, in_dim = x.shape
    out_p = prep["wl"].shape[1]
    hid_p = prep["w1"].shape[1]
    n_hidden = prep["wh"].shape[0]
    assert n_hidden == depth - 1

    if B < xla_fallback_below:
        # Tiny batch: one grid step of pure overhead — let XLA fuse it instead.
        return _xla_forward(x, prep, out_dim=out_dim, depth=depth,
                            negative_slope=negative_slope)

    # Batch tile: multiple of 8 sublanes; large by default (weights are resident so
    # activation VMEM is the only per-tile cost). Pad ragged batch with zero rows.
    tb = min(block_b, _round_up(B, 8))
    # v7x megacore: prefer >= 2 grid steps (both TensorCores) when the batch allows.
    if B > 8 and _round_up(B, tb) // tb < 2:
        tb = max(8, _round_up((B + 1) // 2, 8))
    b_pad = _round_up(B, tb)
    if b_pad != B:
        x = jnp.pad(x, ((0, b_pad - B), (0, 0)))
    grid = (b_pad // tb,)

    def const_spec(shape):
        return pl.BlockSpec(shape, lambda i, _s=len(shape): (0,) * _s)

    in_specs = [
        pl.BlockSpec((tb, in_dim), lambda i: (i, 0)),   # activation tile (pipelined)
        const_spec(prep["w1"].shape),                    # weights: resident across grid
        const_spec(prep["b1"].shape),
        const_spec(prep["wh"].shape),
        const_spec(prep["bh"].shape),
        const_spec(prep["wp"].shape),
        const_spec(prep["bp"].shape),
        const_spec(prep["wl"].shape),
        const_spec(prep["bl"].shape),
    ]
    out_specs = pl.BlockSpec((tb, out_p), lambda i: (i, 0))

    # VMEM budget: Pallas double-buffers even constant-index inputs -> 2x weights,
    # plus double-buffered activation in/out tiles, plus headroom. Clamp to the
    # [32 MiB, 64 MiB] range (safe on v5e/v6e/v7x).
    weight_bytes = sum(int(v.size) * v.dtype.itemsize for v in prep.values())
    act_bytes = tb * (in_dim * x.dtype.itemsize + out_p * jnp.dtype(out_dtype).itemsize)
    needed = 2 * weight_bytes + 2 * act_bytes + (2 << 20)
    vmem_limit = int(min(max(needed, 32 << 20), 64 << 20))

    flops = 2 * b_pad * (in_dim * hid_p + (depth - 1) * hid_p * hid_p
                         + hid_p * hid_p + hid_p * out_p)
    cost = pl.CostEstimate(
        flops=int(flops),
        transcendentals=int(b_pad * out_p),
        bytes_accessed=int(b_pad * (in_dim * x.dtype.itemsize
                                    + out_p * jnp.dtype(out_dtype).itemsize)
                           + weight_bytes),
    )

    kernel = functools.partial(
        action_estimator_kernel,
        depth=depth,
        negative_slope=negative_slope,
        compute_dtype=prep["w1"].dtype,
    )

    out = pl.pallas_call(
        kernel,
        out_shape=jax.ShapeDtypeStruct((b_pad, out_p), out_dtype),
        grid=grid,
        in_specs=in_specs,
        out_specs=out_specs,
        compiler_params=pltpu.CompilerParams(
            dimension_semantics=("parallel",),
            vmem_limit_bytes=vmem_limit,
        ),
        cost_estimate=cost,
    )(
        x,
        prep["w1"], prep["b1"],
        prep["wh"], prep["bh"],
        prep["wp"], prep["bp"],
        prep["wl"], prep["bl"],
    )
    if return_padded:
        # Consumer accepts lane-dense padded [b_pad, out_p]; skips an extra HBM pass.
        return out
    return out[:B, :out_dim]


def init_params(key, input_dim, hidden, output_dim, depth):
    """Deterministic synthetic parameters. PyTorch Linear weight is [out,in];
    we store the transpose [in,out] so the kernel can do x @ W_t."""
    ks = jax.random.split(key, 8)

    def lin(kw, kb, fan_in, fan_out):
        bound = 1.0 / jnp.sqrt(fan_in)
        w = jax.random.uniform(kw, (fan_in, fan_out), jnp.float32, -bound, bound)
        b = jax.random.uniform(kb, (1, fan_out), jnp.float32, -bound, bound)
        return w, b

    w1, b1 = lin(ks[0], ks[1], input_dim, hidden)

    kh = jax.random.split(ks[2], 2 * (depth - 1))
    wh_list, bh_list = [], []
    for i in range(depth - 1):
        w, b = lin(kh[2 * i], kh[2 * i + 1], hidden, hidden)
        wh_list.append(w)
        bh_list.append(b)
    wh = jnp.stack(wh_list, axis=0)              # [depth-1, hidden, hidden]
    bh = jnp.stack(bh_list, axis=0)              # [depth-1, 1, hidden]

    wp, bp = lin(ks[3], ks[4], hidden, hidden)
    wl, bl = lin(ks[5], ks[6], hidden, output_dim)

    return dict(w1=w1, b1=b1, wh=wh, bh=bh, wp=wp, bp=bp, wl=wl, bl=bl)


def reference_forward(x, params, *, depth=4, negative_slope=0.01, scale=1.5):
    """Pure-JAX f32 reference matching the PyTorch module (dropout = identity, eval)."""
    h = 4.0 * (x - 0.5)
    h = h @ params["w1"] + params["b1"]
    h = jnp.where(h >= 0, h, negative_slope * h)
    for i in range(depth - 1):
        h = h @ params["wh"][i] + params["bh"][i]
        h = jnp.where(h >= 0, h, negative_slope * h)
    h = h @ params["wp"] + params["bp"]
    h = jnp.where(h >= 0, h, negative_slope * h)
    y = h @ params["wl"] + params["bl"]
    return 0.5 + 0.7 * jnp.tanh(y * scale)


if __name__ == "__main__":
    B, INPUT_DIM, HIDDEN, OUTPUT_DIM, DEPTH = 8, 16, 32, 16, 4

    key = jax.random.PRNGKey(0)
    kx, kp = jax.random.split(key)
    x = jax.random.uniform(kx, (B, INPUT_DIM), jnp.float32)
    params = init_params(kp, INPUT_DIM, HIDDEN, OUTPUT_DIM, DEPTH)
    prep = prepare_params(params, scale=1.5)

    out = action_estimator_forward(x, prep, out_dim=OUTPUT_DIM, depth=DEPTH)
    out = jax.block_until_ready(out)

    ref = reference_forward(x, params, depth=DEPTH)
    assert out.shape == (B, OUTPUT_DIM)
    # bf16 matmul operands (f32 accumulation) + folded affine/scale vs f32 reference:
    # pre-tanh logits differ by ~1e-2 relative; tanh saturation + 0.7 scale keeps the
    # output error well inside 5e-2 absolute on the [-0.2, 1.2] output range.
    assert jnp.allclose(out, ref, atol=5e-2, rtol=5e-2), "mismatch vs reference"

    print("KERNEL_OK")
</pallas_src>

<mosaic_0001>
module attributes {stable_mosaic.version = 11 : i64} {
  func.func @action_estimator_kernel(%arg0: i32, %arg1: memref<8x16xf32, #tpu.memory_space<vmem>>, %arg2: memref<16x128xbf16, #tpu.memory_space<vmem>>, %arg3: memref<1x128xf32, #tpu.memory_space<vmem>>, %arg4: memref<3x128x128xbf16, #tpu.memory_space<vmem>>, %arg5: memref<3x1x128xf32, #tpu.memory_space<vmem>>, %arg6: memref<128x128xbf16, #tpu.memory_space<vmem>>, %arg7: memref<1x128xf32, #tpu.memory_space<vmem>>, %arg8: memref<128x128xbf16, #tpu.memory_space<vmem>>, %arg9: memref<1x128xf32, #tpu.memory_space<vmem>>, %arg10: memref<8x128xf32, #tpu.memory_space<vmem>>) attributes {dimension_semantics = [#tpu.dimension_semantics<parallel>], iteration_bounds = array<i64: 1>, scalar_prefetch = 0 : i64, scratch_operands = 0 : i64, tpu.core_type = #tpu.core_type<tc>, window_params = [{transform_indices = @transform_0, window_bounds = array<i64: 8, 16>}, {pipeline_mode = #tpu.pipeline_mode<synchronous>, transform_indices = @transform_1, window_bounds = array<i64: 16, 128>}, {pipeline_mode = #tpu.pipeline_mode<synchronous>, transform_indices = @transform_2, window_bounds = array<i64: 1, 128>}, {pipeline_mode = #tpu.pipeline_mode<synchronous>, transform_indices = @transform_3, window_bounds = array<i64: 3, 128, 128>}, {pipeline_mode = #tpu.pipeline_mode<synchronous>, transform_indices = @transform_4, window_bounds = array<i64: 3, 1, 128>}, {pipeline_mode = #tpu.pipeline_mode<synchronous>, transform_indices = @transform_5, window_bounds = array<i64: 128, 128>}, {pipeline_mode = #tpu.pipeline_mode<synchronous>, transform_indices = @transform_6, window_bounds = array<i64: 1, 128>}, {pipeline_mode = #tpu.pipeline_mode<synchronous>, transform_indices = @transform_7, window_bounds = array<i64: 128, 128>}, {pipeline_mode = #tpu.pipeline_mode<synchronous>, transform_indices = @transform_8, window_bounds = array<i64: 1, 128>}, {transform_indices = @transform_9, window_bounds = array<i64: 8, 128>}]} {
    %c0 = arith.constant 0 : index
    %c0_0 = arith.constant 0 : index
    %0 = vector.load %arg1[%c0, %c0_0] : memref<8x16xf32, #tpu.memory_space<vmem>>, vector<8x16xf32>
    %1 = arith.truncf %0 : vector<8x16xf32> to vector<8x16xbf16>
    %c0_1 = arith.constant 0 : index
    %c0_2 = arith.constant 0 : index
    %2 = vector.load %arg2[%c0_1, %c0_2] : memref<16x128xbf16, #tpu.memory_space<vmem>>, vector<16x128xbf16>
    %cst = arith.constant dense<0.000000e+00> : vector<8x128xf32>
    %3 = tpu.matmul %1, %2, %cst {dimension_numbers = #tpu.dot_dimension_numbers<[1], [0], [0], [1], [0, 0, 1, 1], [], []>} : vector<8x16xbf16>, vector<16x128xbf16>, vector<8x128xf32> -> vector<8x128xf32>
    %c0_3 = arith.constant 0 : index
    %c0_4 = arith.constant 0 : index
    %4 = vector.load %arg3[%c0_3, %c0_4] : memref<1x128xf32, #tpu.memory_space<vmem>>, vector<1x128xf32>
    %5 = vector.broadcast %4 : vector<1x128xf32> to vector<8x128xf32>
    %6 = arith.addf %3, %5 : vector<8x128xf32>
    %cst_5 = arith.constant 0.000000e+00 : f32
    %7 = vector.broadcast %cst_5 : f32 to vector<8x128xf32>
    %8 = arith.cmpf oge, %6, %7 : vector<8x128xf32>
    %cst_6 = arith.constant 0.00999999977 : f32
    %9 = vector.broadcast %cst_6 : f32 to vector<8x128xf32>
    %10 = arith.mulf %9, %6 : vector<8x128xf32>
    %11 = arith.select %8, %6, %10 : vector<8x128xi1>, vector<8x128xf32>
    %12 = arith.truncf %11 : vector<8x128xf32> to vector<8x128xbf16>
    %c0_7 = arith.constant 0 : index
    %c0_8 = arith.constant 0 : index
    %c0_9 = arith.constant 0 : index
    %13 = vector.load %arg4[%c0_7, %c0_8, %c0_9] : memref<3x128x128xbf16, #tpu.memory_space<vmem>>, vector<1x128x128xbf16>
    %14 = vector.shape_cast %13 : vector<1x128x128xbf16> to vector<128x128xbf16>
    %cst_10 = arith.constant dense<0.000000e+00> : vector<8x128xf32>
    %15 = tpu.matmul %12, %14, %cst_10 {dimension_numbers = #tpu.dot_dimension_numbers<[1], [0], [0], [1], [0, 0, 1, 1], [], []>} : vector<8x128xbf16>, vector<128x128xbf16>, vector<8x128xf32> -> vector<8x128xf32>
    %c0_11 = arith.constant 0 : index
    %c0_12 = arith.constant 0 : index
    %c0_13 = arith.constant 0 : index
    %16 = vector.load %arg5[%c0_11, %c0_12, %c0_13] : memref<3x1x128xf32, #tpu.memory_space<vmem>>, vector<1x1x128xf32>
    %17 = vector.shape_cast %16 : vector<1x1x128xf32> to vector<1x128xf32>
    %18 = vector.broadcast %17 : vector<1x128xf32> to vector<8x128xf32>
    %19 = arith.addf %15, %18 : vector<8x128xf32>
    %cst_14 = arith.constant 0.000000e+00 : f32
    %20 = vector.broadcast %cst_14 : f32 to vector<8x128xf32>
    %21 = arith.cmpf oge, %19, %20 : vector<8x128xf32>
    %cst_15 = arith.constant 0.00999999977 : f32
    %22 = vector.broadcast %cst_15 : f32 to vector<8x128xf32>
    %23 = arith.mulf %22, %19 : vector<8x128xf32>
    %24 = arith.select %21, %19, %23 : vector<8x128xi1>, vector<8x128xf32>
    %25 = arith.truncf %24 : vector<8x128xf32> to vector<8x128xbf16>
    %c1 = arith.constant 1 : index
    %c0_16 = arith.constant 0 : index
    %c0_17 = arith.constant 0 : index
    %26 = vector.load %arg4[%c1, %c0_16, %c0_17] : memref<3x128x128xbf16, #tpu.memory_space<vmem>>, vector<1x128x128xbf16>
    %27 = vector.shape_cast %26 : vector<1x128x128xbf16> to vector<128x128xbf16>
    %cst_18 = arith.constant dense<0.000000e+00> : vector<8x128xf32>
    %28 = tpu.matmul %25, %27, %cst_18 {dimension_numbers = #tpu.dot_dimension_numbers<[1], [0], [0], [1], [0, 0, 1, 1], [], []>} : vector<8x128xbf16>, vector<128x128xbf16>, vector<8x128xf32> -> vector<8x128xf32>
    %c1_19 = arith.constant 1 : index
    %c0_20 = arith.constant 0 : index
    %c0_21 = arith.constant 0 : index
    %29 = vector.load %arg5[%c1_19, %c0_20, %c0_21] : memref<3x1x128xf32, #tpu.memory_space<vmem>>, vector<1x1x128xf32>
    %30 = vector.shape_cast %29 : vector<1x1x128xf32> to vector<1x128xf32>
    %31 = vector.broadcast %30 : vector<1x128xf32> to vector<8x128xf32>
    %32 = arith.addf %28, %31 : vector<8x128xf32>
    %cst_22 = arith.constant 0.000000e+00 : f32
    %33 = vector.broadcast %cst_22 : f32 to vector<8x128xf32>
    %34 = arith.cmpf oge, %32, %33 : vector<8x128xf32>
    %cst_23 = arith.constant 0.00999999977 : f32
    %35 = vector.broadcast %cst_23 : f32 to vector<8x128xf32>
    %36 = arith.mulf %35, %32 : vector<8x128xf32>
    %37 = arith.select %34, %32, %36 : vector<8x128xi1>, vector<8x128xf32>
    %38 = arith.truncf %37 : vector<8x128xf32> to vector<8x128xbf16>
    %c2 = arith.constant 2 : index
    %c0_24 = arith.constant 0 : index
    %c0_25 = arith.constant 0 : index
    %39 = vector.load %arg4[%c2, %c0_24, %c0_25] : memref<3x128x128xbf16, #tpu.memory_space<vmem>>, vector<1x128x128xbf16>
    %40 = vector.shape_cast %39 : vector<1x128x128xbf16> to vector<128x128xbf16>
    %cst_26 = arith.constant dense<0.000000e+00> : vector<8x128xf32>
    %41 = tpu.matmul %38, %40, %cst_26 {dimension_numbers = #tpu.dot_dimension_numbers<[1], [0], [0], [1], [0, 0, 1, 1], [], []>} : vector<8x128xbf16>, vector<128x128xbf16>, vector<8x128xf32> -> vector<8x128xf32>
    %c2_27 = arith.constant 2 : index
    %c0_28 = arith.constant 0 : index
    %c0_29 = arith.constant 0 : index
    %42 = vector.load %arg5[%c2_27, %c0_28, %c0_29] : memref<3x1x128xf32, #tpu.memory_space<vmem>>, vector<1x1x128xf32>
    %43 = vector.shape_cast %42 : vector<1x1x128xf32> to vector<1x128xf32>
    %44 = vector.broadcast %43 : vector<1x128xf32> to vector<8x128xf32>
    %45 = arith.addf %41, %44 : vector<8x128xf32>
    %cst_30 = arith.constant 0.000000e+00 : f32
    %46 = vector.broadcast %cst_30 : f32 to vector<8x128xf32>
    %47 = arith.cmpf oge, %45, %46 : vector<8x128xf32>
    %cst_31 = arith.constant 0.00999999977 : f32
    %48 = vector.broadcast %cst_31 : f32 to vector<8x128xf32>
    %49 = arith.mulf %48, %45 : vector<8x128xf32>
    %50 = arith.select %47, %45, %49 : vector<8x128xi1>, vector<8x128xf32>
    %51 = arith.truncf %50 : vector<8x128xf32> to vector<8x128xbf16>
    %c0_32 = arith.constant 0 : index
    %c0_33 = arith.constant 0 : index
    %52 = vector.load %arg6[%c0_32, %c0_33] : memref<128x128xbf16, #tpu.memory_space<vmem>>, vector<128x128xbf16>
    %cst_34 = arith.constant dense<0.000000e+00> : vector<8x128xf32>
    %53 = tpu.matmul %51, %52, %cst_34 {dimension_numbers = #tpu.dot_dimension_numbers<[1], [0], [0], [1], [0, 0, 1, 1], [], []>} : vector<8x128xbf16>, vector<128x128xbf16>, vector<8x128xf32> -> vector<8x128xf32>
    %c0_35 = arith.constant 0 : index
    %c0_36 = arith.constant 0 : index
    %54 = vector.load %arg7[%c0_35, %c0_36] : memref<1x128xf32, #tpu.memory_space<vmem>>, vector<1x128xf32>
    %55 = vector.broadcast %54 : vector<1x128xf32> to vector<8x128xf32>
    %56 = arith.addf %53, %55 : vector<8x128xf32>
    %cst_37 = arith.constant 0.000000e+00 : f32
    %57 = vector.broadcast %cst_37 : f32 to vector<8x128xf32>
    %58 = arith.cmpf oge, %56, %57 : vector<8x128xf32>
    %cst_38 = arith.constant 0.00999999977 : f32
    %59 = vector.broadcast %cst_38 : f32 to vector<8x128xf32>
    %60 = arith.mulf %59, %56 : vector<8x128xf32>
    %61 = arith.select %58, %56, %60 : vector<8x128xi1>, vector<8x128xf32>
    %62 = arith.truncf %61 : vector<8x128xf32> to vector<8x128xbf16>
    %c0_39 = arith.constant 0 : index
    %c0_40 = arith.constant 0 : index
    %63 = vector.load %arg8[%c0_39, %c0_40] : memref<128x128xbf16, #tpu.memory_space<vmem>>, vector<128x128xbf16>
    %cst_41 = arith.constant dense<0.000000e+00> : vector<8x128xf32>
    %64 = tpu.matmul %62, %63, %cst_41 {dimension_numbers = #tpu.dot_dimension_numbers<[1], [0], [0], [1], [0, 0, 1, 1], [], []>} : vector<8x128xbf16>, vector<128x128xbf16>, vector<8x128xf32> -> vector<8x128xf32>
    %c0_42 = arith.constant 0 : index
    %c0_43 = arith.constant 0 : index
    %65 = vector.load %arg9[%c0_42, %c0_43] : memref<1x128xf32, #tpu.memory_space<vmem>>, vector<1x128xf32>
    %66 = vector.broadcast %65 : vector<1x128xf32> to vector<8x128xf32>
    %67 = arith.addf %64, %66 : vector<8x128xf32>
    %68 = math.tanh %67 : vector<8x128xf32>
    %cst_44 = arith.constant 0.699999988 : f32
    %69 = vector.broadcast %cst_44 : f32 to vector<8x128xf32>
    %70 = arith.mulf %69, %68 : vector<8x128xf32>
    %cst_45 = arith.constant 5.000000e-01 : f32
    %71 = vector.broadcast %cst_45 : f32 to vector<8x128xf32>
    %72 = arith.addf %71, %70 : vector<8x128xf32>
    %c0_46 = arith.constant 0 : index
    %c0_47 = arith.constant 0 : index
    %73 = vector.load %arg10[%c0_46, %c0_47] : memref<8x128xf32, #tpu.memory_space<vmem>>, vector<8x128xf32>
    tpu.vector_store %arg10[%c0_46, %c0_47], %72 {strides = array<i32>} : memref<8x128xf32, #tpu.memory_space<vmem>>, vector<8x128xf32>,
    return
  }
  func.func @transform_0(%arg0: i32) -> (i32, i32) {
    %c0_i32 = arith.constant 0 : i32
    %c0_i32_0 = arith.constant 0 : i32
    return %arg0, %c0_i32 : i32, i32
  }
  func.func @transform_1(%arg0: i32) -> (i32, i32) {
    %c0_i32 = arith.constant 0 : i32
    %c0_i32_0 = arith.constant 0 : i32
    %c0_i32_1 = arith.constant 0 : i32
    return %c0_i32, %c0_i32_0 : i32, i32
  }
  func.func @transform_2(%arg0: i32) -> (i32, i32) {
    %c0_i32 = arith.constant 0 : i32
    %c0_i32_0 = arith.constant 0 : i32
    %c0_i32_1 = arith.constant 0 : i32
    return %c0_i32, %c0_i32_0 : i32, i32
  }
  func.func @transform_3(%arg0: i32) -> (i32, i32, i32) {
    %c0_i32 = arith.constant 0 : i32
    %c0_i32_0 = arith.constant 0 : i32
    %c0_i32_1 = arith.constant 0 : i32
    %c0_i32_2 = arith.constant 0 : i32
    return %c0_i32, %c0_i32_0, %c0_i32_1 : i32, i32, i32
  }
  func.func @transform_4(%arg0: i32) -> (i32, i32, i32) {
    %c0_i32 = arith.constant 0 : i32
    %c0_i32_0 = arith.constant 0 : i32
    %c0_i32_1 = arith.constant 0 : i32
    %c0_i32_2 = arith.constant 0 : i32
    return %c0_i32, %c0_i32_0, %c0_i32_1 : i32, i32, i32
  }
  func.func @transform_5(%arg0: i32) -> (i32, i32) {
    %c0_i32 = arith.constant 0 : i32
    %c0_i32_0 = arith.constant 0 : i32
    %c0_i32_1 = arith.constant 0 : i32
    return %c0_i32, %c0_i32_0 : i32, i32
  }
  func.func @transform_6(%arg0: i32) -> (i32, i32) {
    %c0_i32 = arith.constant 0 : i32
    %c0_i32_0 = arith.constant 0 : i32
    %c0_i32_1 = arith.constant 0 : i32
    return %c0_i32, %c0_i32_0 : i32, i32
  }
  func.func @transform_7(%arg0: i32) -> (i32, i32) {
    %c0_i32 = arith.constant 0 : i32
    %c0_i32_0 = arith.constant 0 : i32
    %c0_i32_1 = arith.constant 0 : i32
    return %c0_i32, %c0_i32_0 : i32, i32
  }
  func.func @transform_8(%arg0: i32) -> (i32, i32) {
    %c0_i32 = arith.constant 0 : i32
    %c0_i32_0 = arith.constant 0 : i32
    %c0_i32_1 = arith.constant 0 : i32
    return %c0_i32, %c0_i32_0 : i32, i32
  }
  func.func @transform_9(%arg0: i32) -> (i32, i32) {
    %c0_i32 = arith.constant 0 : i32
    %c0_i32_0 = arith.constant 0 : i32
    return %arg0, %c0_i32 : i32, i32
  }
}

</mosaic_0001>

<bundles_post_ra>
// kernel: tpu_custom_call.1
= control target key start
LH: loop header
LB: loop body
LE: loop exit
PB: predicated region body
PF: predicated region fallthrough
CT: control target
= control target key end

     0   :  { %14 = vsyncpa [#allocation3], 0  ;;  %s1372_s0 = inlined_call_operand.hbm [shape: f32[8,16], index: 0, kind: input, shape index: {}]   ;;  %s1373_s1 = inlined_call_operand.hbm [shape: bf16[16,128], index: 1, kind: input, shape index: {}]   ;;  %s1374_s2 = inlined_call_operand.vmem [shape: f32[1,128], index: 2, kind: input, shape index: {}]   ;;  %s1375_s3 = inlined_call_operand.hbm [shape: bf16[3,128,128], index: 3, kind: input, shape index: {}]   ;;  %s1376_s4 = inlined_call_operand.vmem [shape: f32[3,1,128], index: 4, kind: input, shape index: {}]   ;;  %s1377_s5 = inlined_call_operand.hbm [shape: bf16[128,128], index: 5, kind: input, shape index: {}]   ;;  %s1378_s6 = inlined_call_operand.vmem [shape: f32[1,128], index: 6, kind: input, shape index: {}]   ;;  %s1379_s7 = inlined_call_operand.hbm [shape: bf16[128,128], index: 7, kind: input, shape index: {}]   ;;  %s1380_s8 = inlined_call_operand.vmem [shape: f32[1,128], index: 8, kind: input, shape index: {}]   ;;  %s1381_s9 = inlined_call_operand.hbm [shape: f32[8,128], index: 9, kind: output, shape index: {}]  }
   0x1   :  { %15 = vsyncpa [#allocation6], 0 }
   0x2   :  { %16 = vsyncpa [#allocation9], 0 }
   0x3   :  { %17 = vsyncpa [#allocation4], 0  ;;  %s1157_s30 = smov [#allocation5]   ;;  %s1017_s13 = scalar_lea.hbm %s1373_s1, 128 }
   0x4   :  { %s33_s10 = sshll.u32 %s1157_s30, 4  ;;  %p1018_p0 = scmp.ne.s32.totalorder %s1373_s1, %s1017_s13  ;;  %s34_s10 = int_to_ptr.vmem [resolvable:$true] %s33_s10 }
   0x5   :  { %p1021_p1 = scmp.lt.u32.totalorder %s1017_s13, %s1373_s1 }
   0x7   :  { %p1023_p2 = pnand %p1021_p1, %p1018_p0 }
   0x9   :  { %1026 = shalt.err (!%p1023_p2)
}
   0xa   :  { %s1027_s18 = scalar_lea.vmem %s34_s10, 128  ;;  %p1032_p4 = scmp.lt.s32.totalorder %s34_s10, %s34_s10 }
   0xb   :  { %p1028_p3 = scmp.ne.s32.totalorder %s34_s10, %s1027_s18  ;;  %p1033_p5 = scmp.lt.s32.totalorder %s1027_s18, %s1027_s18 }
   0xd   :  { %p1034_p6 = por %p1033_p5, %p1032_p4 }
   0xf   :  { %p1035_p7 = pnand %p1034_p6, %p1028_p3 }
  0x11   :  { %1038 = shalt.err (!%p1035_p7)
}
  0x12   :  { %s1158_s19 = smov 64   ;;  %s1159_s20 = smov 4  }
  0x13   :  { %39 = dma.hbm_to_vmem [thread:$0]  %s1373_s1, 128, %s34_s10, [#allocation6], %s1158_s19, %s1158_s19, %s1159_s20  }
  0x14   :  { %s1160_s23 = smov [#allocation8]   ;;  %s1161_s25 = smov [#allocation2]  }
  0x15   :  { %s61_s24 = sshll.u32 %s1160_s23, 4  ;;  %s24_s26 = sshll.u32 %s1161_s25, 4  ;;  %s62_s24 = int_to_ptr.vmem [resolvable:$true] %s61_s24  ;;  %s25_s26 = int_to_ptr.vmem [resolvable:$true] %s24_s26 }
  0x16   :  { %s1039_s29 = scalar_lea.hbm %s1377_s5, 1024 }
  0x17   :  { %p1040_p8 = scmp.ne.s32.totalorder %s1377_s5, %s1039_s29  ;;  %p1043_p9 = scmp.lt.u32.totalorder %s1039_s29, %s1377_s5 }
  0x19   :  { %p1045_p10 = pnand %p1043_p9, %p1040_p8 }
  0x1b   :  { %1048 = shalt.err (!%p1045_p10)
}
  0x1c   :  { %s1049_s1 = scalar_lea.vmem %s62_s24, 1024  ;;  %p1054_p12 = scmp.lt.s32.totalorder %s62_s24, %s62_s24 }
  0x1d   :  { %p1050_p11 = scmp.ne.s32.totalorder %s62_s24, %s1049_s1  ;;  %p1055_p13 = scmp.lt.s32.totalorder %s1049_s1, %s1049_s1 }
  0x1f   :  { %p1056_p0 = por %p1055_p13, %p1054_p12 }
  0x21   :  { %p1057_p1 = pnand %p1056_p0, %p1050_p11 }
  0x23   :  { %1060 = shalt.err (!%p1057_p1)
}
  0x24   :  { %67 = dma.hbm_to_vmem [thread:$0]  %s1377_s5, 1024, %s62_s24, [#allocation9], %s1158_s19, %s1158_s19, %s1159_s20  }
  0x25   :  { %s1061_s17 = scalar_lea.hbm %s1372_s0, 128 }
  0x26   :  { %p1062_p2 = scmp.ne.s32.totalorder %s1372_s0, %s1061_s17  ;;  %p1065_p3 = scmp.lt.u32.totalorder %s1061_s17, %s1372_s0 }
  0x28   :  { %p1067_p4 = pnand %p1065_p3, %p1062_p2 }
  0x2a   :  { %1070 = shalt.err (!%p1067_p4)
}
  0x2b   :  { %s1071_s25 = scalar_lea.vmem %s25_s26, 128  ;;  %p1076_p6 = scmp.lt.s32.totalorder %s25_s26, %s25_s26 }
  0x2c   :  { %p1072_p5 = scmp.ne.s32.totalorder %s25_s26, %s1071_s25  ;;  %p1077_p7 = scmp.lt.s32.totalorder %s1071_s25, %s1071_s25 }
  0x2e   :  { %p1078_p8 = por %p1077_p7, %p1076_p6 }
  0x30   :  { %p1079_p9 = pnand %p1078_p8, %p1072_p5 }
  0x32   :  { %1082 = shalt.err (!%p1079_p9)
}
  0x33   :  { %27 = dma.hbm_to_vmem [thread:$0]  %s1372_s0, 128, %s25_s26, [#allocation3]  }
  0x34   :  { %s1162_s27 = smov [#allocation7]   ;;  %s1163_s29 = smov [#allocation10]  }
  0x35   :  { %s47_s28 = sshll.u32 %s1162_s27, 4  ;;  %s75_s30 = sshll.u32 %s1163_s29, 4  ;;  %s48_s28 = int_to_ptr.vmem [resolvable:$true] %s47_s28  ;;  %s76_s30 = int_to_ptr.vmem [resolvable:$true] %s75_s30 }
  0x36   :  { %s1083_s13 = scalar_lea.hbm %s1375_s3, 3072 }
  0x37   :  { %p1084_p10 = scmp.ne.s32.totalorder %s1375_s3, %s1083_s13  ;;  %p1087_p11 = scmp.lt.u32.totalorder %s1083_s13, %s1375_s3 }
  0x39   :  { %p1089_p12 = pnand %p1087_p11, %p1084_p10 }
  0x3b   :  { %1092 = shalt.err (!%p1089_p12)
}
  0x3c   :  { %s1093_s0 = scalar_lea.vmem %s48_s28, 3072  ;;  %p1098_p0 = scmp.lt.s32.totalorder %s48_s28, %s48_s28 }
  0x3d   :  { %p1094_p13 = scmp.ne.s32.totalorder %s48_s28, %s1093_s0  ;;  %p1099_p1 = scmp.lt.s32.totalorder %s1093_s0, %s1093_s0 }
  0x3f   :  { %p1100_p2 = por %p1099_p1, %p1098_p0 }
  0x41   :  { %p1101_p3 = pnand %p1100_p2, %p1094_p13 }
  0x43   :  { %1104 = shalt.err (!%p1101_p3)
}
  0x44   :  { %53 = dma.hbm_to_vmem [thread:$0]  %s1375_s3, 3072, %s48_s28, [#allocation6], %s1158_s19, %s1158_s19, %s1159_s20  }
  0x45   :  { %s1105_s21 = scalar_lea.hbm %s1379_s7, 1024 }
  0x46   :  { %p1106_p4 = scmp.ne.s32.totalorder %s1379_s7, %s1105_s21  ;;  %p1109_p5 = scmp.lt.u32.totalorder %s1105_s21, %s1379_s7 }
  0x48   :  { %p1111_p6 = pnand %p1109_p5, %p1106_p4 }
  0x4a   :  { %1114 = shalt.err (!%p1111_p6)
}
  0x4b   :  { %s1115_s24 = scalar_lea.vmem %s76_s30, 1024  ;;  %p1120_p8 = scmp.lt.s32.totalorder %s76_s30, %s76_s30 }
  0x4c   :  { %p1116_p7 = scmp.ne.s32.totalorder %s76_s30, %s1115_s24  ;;  %p1121_p9 = scmp.lt.s32.totalorder %s1115_s24, %s1115_s24 }
  0x4e   :  { %p1122_p10 = por %p1121_p9, %p1120_p8 }
  0x50   :  { %p1123_p11 = pnand %p1122_p10, %p1116_p7 }
  0x52   :  { %1126 = shalt.err (!%p1123_p11)
}
  0x53   :  { %81 = dma.hbm_to_vmem [thread:$0]  %s1379_s7, 1024, %s76_s30, [#allocation9], %s1158_s19, %s1158_s19, %s1159_s20  }
  0x54   :  { %1149 = dma.done.wait [#allocation3], 128  }
  0x55   :  { %1150 = vsyncadd [#allocation3], 4294967168 }
  0x56   :  { %1151 = dma.done.wait [#allocation6], 3200  }
  0x57   :  { %1152 = vsyncadd [#allocation6], 4294964096 }
  0x58   :  { %1153 = dma.done.wait [#allocation9], 2048  }
  0x59   :  { %1154 = vsyncadd [#allocation9], 4294965248  ;;  %v1164_v0 = vmov 0.0   ;;  %vm1165_vm0 = vmmov 0   ;;  %v974_v1 = vld [vmem:[#allocation5] sm:$0xff]   ;;  %v100_v2 = vld [vmem:[#allocation2] sm:$0xff] }
  0x5a   :  { %858 = vmatprep.subr.bf16.mxu0 %v1164_v0  ;;  %860 = vmatprep.mubr.msk.bf16.mxu0 %vm1165_vm0, %v1164_v0  ;;  %v101_v3 = vpack.c.bf16 %v100_v2, %v100_v2  ;;  %vm117_vm1 = vcmask 130048   ;;  %v975_v4 = vld [vmem:[#allocation7] sm:$0xff]   ;;  %v976_v5 = vld [vmem:[#allocation7 + $0x8] sm:$0xff]   ;;  %v977_v6 = vld [vmem:[#allocation7 + $0x10] sm:$0xff]  }
  0x5b   :  { %864 = vmatprep.subr.bf16.mxu1 %v1164_v0  ;;  %880 = vmatprep.mubr.msk.bf16.mxu1 %vm1165_vm0, %v1164_v0  ;;  %v978_v7 = vld [vmem:[#allocation7 + $0x18] sm:$0xff]   ;;  %v979_v8 = vld [vmem:[#allocation7 + $0x20] sm:$0xff]   ;;  %v980_v9 = vld [vmem:[#allocation7 + $0x28] sm:$0xff]  }
  0x5c   :  { %859 = vmatpush3.bf16.msra.mxu0 %v974_v1  ;;  %865 = vmatpush3.bf16.msra.mxu1 %v975_v4  ;;  %v981_v10 = vld [vmem:[#allocation7 + $0x30] sm:$0xff]   ;;  %v982_v11 = vld [vmem:[#allocation7 + $0x38] sm:$0xff]   ;;  %v983_v12 = vld [vmem:[#allocation7 + $0x40] sm:$0xff]  }
  0x5d   :  { %884 = vmatprep.subr.bf16.mxu0 %v1164_v0  ;;  %866 = vmatprep.subr.bf16.mxu1 %v1164_v0  ;;  %v984_v13 = vld [vmem:[#allocation7 + $0x48] sm:$0xff]   ;;  %v985_v14 = vld [vmem:[#allocation7 + $0x50] sm:$0xff]   ;;  %v986_v15 = vld [vmem:[#allocation7 + $0x58] sm:$0xff]  }
  0x5e   :  { %v987_v16 = vld [vmem:[#allocation7 + $0x60] sm:$0xff]   ;;  %v988_v17 = vld [vmem:[#allocation7 + $0x68] sm:$0xff]   ;;  %v761_v18 = vld [vmem:[%s1374_s2] ss:$0 sm:$0xff] }
  0x5f   :  { %861 = vmatmul.mubr.msk.bf16.vlgmr.msra.gmra.mrb[0].mxu0 %vm117_vm1, %v101_v3  ;;  %v989_v27 = vld [vmem:[#allocation7 + $0x70] sm:$0xff]   ;;  %v990_v28 = vld [vmem:[#allocation7 + $0x78] sm:$0xff]   ;;  %v991_v29 = vld [vmem:[#allocation7 + $0x80] sm:$0xff]  }
  0x60   :  { %900 = vmatprep.mubr.msk.bf16.mxu0 %vm1165_vm0, %v1164_v0  ;;  %867 = vmatpush3.bf16.msra.mxu1 %v976_v5  ;;  %v992_v30 = vld [vmem:[#allocation7 + $0x88] sm:$0xff]   ;;  %v993_v31 = vld [vmem:[#allocation7 + $0x90] sm:$0xff]   ;;  %v994_v32 = vld [vmem:[#allocation7 + $0x98] sm:$0xff]  }
  0x61   :  { %868 = vmatprep.subr.bf16.mxu1 %v1164_v0  ;;  %885 = vmatpush3.bf16.msra.mxu0 %v983_v12  ;;  %v995_v33 = vld [vmem:[#allocation7 + $0xa0] sm:$0xff]   ;;  %v996_v34 = vld [vmem:[#allocation7 + $0xa8] sm:$0xff]   ;;  %v764_v35 = vld [vmem:[%s1376_s4] ss:$0 sm:$0xff] }
  0x62   :  { %886 = vmatprep.subr.bf16.mxu0 %v1164_v0  ;;  %v997_v44 = vld [vmem:[#allocation7 + $0xb0] sm:$0xff]   ;;  %v998_v45 = vld [vmem:[#allocation7 + $0xb8] sm:$0xff]   ;;  %v999_v46 = vld [vmem:[#allocation8] sm:$0xff]  }
  0x63   :  { %v1000_v47 = vld [vmem:[#allocation8 + $0x8] sm:$0xff]   ;;  %v1001_v48 = vld [vmem:[#allocation8 + $0x10] sm:$0xff]   ;;  %v1002_v49 = vld [vmem:[#allocation8 + $0x18] sm:$0xff]  }
  0x64   :  { %869 = vmatpush3.bf16.msra.mxu1 %v977_v6  ;;  %v1003_v50 = vld [vmem:[#allocation8 + $0x20] sm:$0xff]   ;;  %v1004_v51 = vld [vmem:[#allocation8 + $0x28] sm:$0xff]   ;;  %v774_v52 = vld [vmem:[%s1376_s4 + $0x1] ss:$0 sm:$0xff] }
  0x65   :  { %870 = vmatprep.subr.bf16.mxu1 %v1164_v0  ;;  %887 = vmatpush3.bf16.msra.mxu0 %v984_v13  ;;  %v1005_v61 = vld [vmem:[#allocation8 + $0x30] sm:$0xff]   ;;  %v1006_v62 = vld [vmem:[#allocation8 + $0x38] sm:$0xff]   ;;  %v1007_v63 = vld [vmem:[#allocation10] sm:$0xff]  }
  0x66   :  { %888 = vmatprep.subr.bf16.mxu0 %v1164_v0  ;;  %v1008_v1 = vld [vmem:[#allocation10 + $0x8] sm:$0xff]   ;;  %v1009_v2 = vld [vmem:[#allocation10 + $0x10] sm:$0xff]   ;;  %v1010_v3 = vld [vmem:[#allocation10 + $0x18] sm:$0xff]  }
  0x67   :  { %v1011_v4 = vld [vmem:[#allocation10 + $0x20] sm:$0xff]   ;;  %v1012_v5 = vld [vmem:[#allocation10 + $0x28] sm:$0xff]   ;;  %v784_v6 = vld [vmem:[%s1376_s4 + $0x2] ss:$0 sm:$0xff] }
  0x68   :  { %871 = vmatpush3.bf16.msra.mxu1 %v978_v7 }
  0x69   :  { %872 = vmatprep.subr.bf16.mxu1 %v1164_v0  ;;  %889 = vmatpush3.bf16.msra.mxu0 %v985_v14 }
  0x6a   :  { %890 = vmatprep.subr.bf16.mxu0 %v1164_v0 }
  0x6c   :  { %873 = vmatpush3.bf16.msra.mxu1 %v979_v8 }
  0x6d   :  { %874 = vmatprep.subr.bf16.mxu1 %v1164_v0  ;;  %891 = vmatpush3.bf16.msra.mxu0 %v986_v15  ;;  %v1013_v15 = vld [vmem:[#allocation10 + $0x30] sm:$0xff]  }
  0x6e   :  { %892 = vmatprep.subr.bf16.mxu0 %v1164_v0 }
  0x70   :  { %875 = vmatpush3.bf16.msra.mxu1 %v980_v9 }
  0x71   :  { %876 = vmatprep.subr.bf16.mxu1 %v1164_v0  ;;  %893 = vmatpush3.bf16.msra.mxu0 %v987_v16  ;;  %v1014_v16 = vld [vmem:[#allocation10 + $0x38] sm:$0xff]  }
  0x72   :  { %894 = vmatprep.subr.bf16.mxu0 %v1164_v0 }
  0x74   :  { %877 = vmatpush3.bf16.msra.mxu1 %v981_v10 }
  0x75   :  { %878 = vmatprep.subr.bf16.mxu1 %v1164_v0  ;;  %895 = vmatpush3.bf16.msra.mxu0 %v988_v17  ;;  %v793_v17 = vld [vmem:[%s1378_s6] ss:$0 sm:$0xff]  ;;  %s1166_s6 = smov [#allocation11]  }
  0x76   :  { %896 = vmatprep.subr.bf16.mxu0 %v1164_v0  ;;  %s750_s10 = sshll.u32 %s1166_s6, 4  ;;  %s751_s10 = int_to_ptr.vmem [resolvable:$true] %s750_s10 }
  0x77   :  { %s1127_s14 = scalar_lea.vmem %s751_s10, 128  ;;  %p1132_p13 = scmp.lt.s32.totalorder %s751_s10, %s751_s10 }
  0x78   :  { %879 = vmatpush3.bf16.msra.mxu1 %v982_v11  ;;  %p1128_p12 = scmp.ne.s32.totalorder %s751_s10, %s1127_s14  ;;  %p1133_p0 = scmp.lt.s32.totalorder %s1127_s14, %s1127_s14 }
  0x79   :  { %904 = vmatprep.subr.bf16.mxu1 %v1164_v0  ;;  %897 = vmatpush3.bf16.msra.mxu0 %v989_v27 }
  0x7a   :  { %898 = vmatprep.subr.bf16.mxu0 %v1164_v0  ;;  %p1134_p1 = por %p1133_p0, %p1132_p13 }
  0x7c   :  { %p1135_p2 = pnand %p1134_p1, %p1128_p12 }
  0x7d   :  { %899 = vmatpush3.bf16.msra.mxu0 %v990_v28 }
  0x7e   :  { %924 = vmatprep.subr.bf16.mxu0 %v1164_v0 }
 0x132   :  { %v155_v19 = vpop.f32.mrb[0].mxu0 }
 0x133   :  { %v156_v20 = vadd.f32 %v761_v18, %v155_v19  ;;  %v862_v21 = vpop.f32.mrb[1].mxu0 }
 0x134   :  { %v158_v22 = vpop.f32.mrb[2].mxu0 }
 0x135   :  { %vm161_vm2 = vcmp.ge.f32.partialorder %v156_v20, 0.0  ;;  %v162_v23 = vmul.f32 0.01, %v156_v20  ;;  %v863_v24 = vpop.f32.mrb[3].mxu0 }
 0x137   :  { %v163_v25 = vsel %vm161_vm2, %v156_v20, %v162_v23 }
 0x138   :  { %v164_v26 = vpack.c.bf16 %v163_v25, %v163_v25 }
 0x13a   :  { %881 = vmatmul.mubr.bf16.vlgmr.msra.gmra.mrb[0].mxu1 %v164_v26 }
 0x13b   :  { %920 = vmatprep.mubr.msk.bf16.mxu1 %vm1165_vm0, %v1164_v0  ;;  %905 = vmatpush3.bf16.msra.mxu1 %v991_v29 }
 0x13c   :  { %906 = vmatprep.subr.bf16.mxu1 %v1164_v0 }
 0x13f   :  { %907 = vmatpush3.bf16.msra.mxu1 %v992_v30 }
 0x140   :  { %908 = vmatprep.subr.bf16.mxu1 %v1164_v0 }
 0x143   :  { %909 = vmatpush3.bf16.msra.mxu1 %v993_v31 }
 0x144   :  { %910 = vmatprep.subr.bf16.mxu1 %v1164_v0 }
 0x147   :  { %911 = vmatpush3.bf16.msra.mxu1 %v994_v32 }
 0x148   :  { %912 = vmatprep.subr.bf16.mxu1 %v1164_v0 }
 0x14b   :  { %913 = vmatpush3.bf16.msra.mxu1 %v995_v33 }
 0x14c   :  { %914 = vmatprep.subr.bf16.mxu1 %v1164_v0 }
 0x14f   :  { %915 = vmatpush3.bf16.msra.mxu1 %v996_v34 }
 0x150   :  { %916 = vmatprep.subr.bf16.mxu1 %v1164_v0 }
 0x153   :  { %917 = vmatpush3.bf16.msra.mxu1 %v997_v44 }
 0x154   :  { %918 = vmatprep.subr.bf16.mxu1 %v1164_v0 }
 0x157   :  { %919 = vmatpush3.bf16.msra.mxu1 %v998_v45 }
 0x158   :  { %944 = vmatprep.subr.bf16.mxu1 %v1164_v0 }
 0x20d   :  { %v270_v36 = vpop.f32.mrb[0].mxu1 }
 0x20e   :  { %v271_v37 = vadd.f32 %v764_v35, %v270_v36  ;;  %v882_v38 = vpop.f32.mrb[1].mxu1 }
 0x20f   :  { %v273_v39 = vpop.f32.mrb[2].mxu1 }
 0x210   :  { %vm276_vm3 = vcmp.ge.f32.partialorder %v271_v37, 0.0  ;;  %v277_v40 = vmul.f32 0.01, %v271_v37  ;;  %v883_v41 = vpop.f32.mrb[3].mxu1 }
 0x212   :  { %v278_v42 = vsel %vm276_vm3, %v271_v37, %v277_v40 }
 0x213   :  { %v279_v43 = vpack.c.bf16 %v278_v42, %v278_v42 }
 0x215   :  { %901 = vmatmul.mubr.bf16.vlgmr.msra.gmra.mrb[4].mxu0 %v279_v43 }
 0x216   :  { %940 = vmatprep.mubr.msk.bf16.mxu0 %vm1165_vm0, %v1164_v0  ;;  %925 = vmatpush3.bf16.msra.mxu0 %v999_v46 }
 0x217   :  { %926 = vmatprep.subr.bf16.mxu0 %v1164_v0 }
 0x21a   :  { %927 = vmatpush3.bf16.msra.mxu0 %v1000_v47 }
 0x21b   :  { %928 = vmatprep.subr.bf16.mxu0 %v1164_v0 }
 0x21e   :  { %929 = vmatpush3.bf16.msra.mxu0 %v1001_v48 }
 0x21f   :  { %930 = vmatprep.subr.bf16.mxu0 %v1164_v0 }
 0x222   :  { %931 = vmatpush3.bf16.msra.mxu0 %v1002_v49 }
 0x223   :  { %932 = vmatprep.subr.bf16.mxu0 %v1164_v0 }
 0x226   :  { %933 = vmatpush3.bf16.msra.mxu0 %v1003_v50 }
 0x227   :  { %934 = vmatprep.subr.bf16.mxu0 %v1164_v0 }
 0x22a   :  { %935 = vmatpush3.bf16.msra.mxu0 %v1004_v51 }
 0x22b   :  { %936 = vmatprep.subr.bf16.mxu0 %v1164_v0 }
 0x22e   :  { %937 = vmatpush3.bf16.msra.mxu0 %v1005_v61 }
 0x22f   :  { %938 = vmatprep.subr.bf16.mxu0 %v1164_v0 }
 0x232   :  { %939 = vmatpush3.bf16.msra.mxu0 %v1006_v62 }
 0x2e8   :  { %v387_v53 = vpop.f32.mrb[4].mxu0 }
 0x2e9   :  { %v388_v54 = vadd.f32 %v774_v52, %v387_v53  ;;  %v902_v55 = vpop.f32.mrb[5].mxu0 }
 0x2ea   :  { %v390_v56 = vpop.f32.mrb[6].mxu0 }
 0x2eb   :  { %vm393_vm4 = vcmp.ge.f32.partialorder %v388_v54, 0.0  ;;  %v394_v57 = vmul.f32 0.01, %v388_v54  ;;  %v903_v58 = vpop.f32.mrb[7].mxu0 }
 0x2ed   :  { %v395_v59 = vsel %vm393_vm4, %v388_v54, %v394_v57 }
 0x2ee   :  { %v396_v60 = vpack.c.bf16 %v395_v59, %v395_v59 }
 0x2f0   :  { %921 = vmatmul.mubr.bf16.vlgmr.msra.gmra.mrb[4].mxu1 %v396_v60 }
 0x2f1   :  { %960 = vmatprep.mubr.msk.bf16.mxu1 %vm1165_vm0, %v1164_v0  ;;  %945 = vmatpush3.bf16.msra.mxu1 %v1007_v63 }
 0x2f2   :  { %946 = vmatprep.subr.bf16.mxu1 %v1164_v0 }
 0x2f5   :  { %947 = vmatpush3.bf16.msra.mxu1 %v1008_v1 }
 0x2f6   :  { %948 = vmatprep.subr.bf16.mxu1 %v1164_v0 }
 0x2f9   :  { %949 = vmatpush3.bf16.msra.mxu1 %v1009_v2 }
 0x2fa   :  { %950 = vmatprep.subr.bf16.mxu1 %v1164_v0 }
 0x2fd   :  { %951 = vmatpush3.bf16.msra.mxu1 %v1010_v3 }
 0x2fe   :  { %952 = vmatprep.subr.bf16.mxu1 %v1164_v0 }
 0x301   :  { %953 = vmatpush3.bf16.msra.mxu1 %v1011_v4 }
 0x302   :  { %954 = vmatprep.subr.bf16.mxu1 %v1164_v0 }
 0x305   :  { %955 = vmatpush3.bf16.msra.mxu1 %v1012_v5 }
 0x306   :  { %956 = vmatprep.subr.bf16.mxu1 %v1164_v0 }
 0x309   :  { %957 = vmatpush3.bf16.msra.mxu1 %v1013_v15 }
 0x30a   :  { %958 = vmatprep.subr.bf16.mxu1 %v1164_v0  ;;  %v802_v0 = vld [vmem:[%s1380_s8] ss:$0 sm:$0xff] }
 0x30d   :  { %959 = vmatpush3.bf16.msra.mxu1 %v1014_v16 }
 0x3c3   :  { %v504_v7 = vpop.f32.mrb[4].mxu1 }
 0x3c4   :  { %v505_v8 = vadd.f32 %v784_v6, %v504_v7  ;;  %v922_v9 = vpop.f32.mrb[5].mxu1 }
 0x3c5   :  { %v507_v10 = vpop.f32.mrb[6].mxu1 }
 0x3c6   :  { %vm510_vm5 = vcmp.ge.f32.partialorder %v505_v8, 0.0  ;;  %v511_v11 = vmul.f32 0.01, %v505_v8  ;;  %v923_v12 = vpop.f32.mrb[7].mxu1 }
 0x3c8   :  { %v512_v13 = vsel %vm510_vm5, %v505_v8, %v511_v11 }
 0x3c9   :  { %v513_v14 = vpack.c.bf16 %v512_v13, %v512_v13 }
 0x3cb   :  { %941 = vmatmul.mubr.bf16.vlgmr.msra.gmra.mrb[8].mxu0 %v513_v14 }
 0x49e   :  { %v619_v18 = vpop.f32.mrb[8].mxu0 }
 0x49f   :  { %v620_v19 = vadd.f32 %v793_v17, %v619_v18  ;;  %v942_v20 = vpop.f32.mrb[9].mxu0 }
 0x4a0   :  { %v622_v21 = vpop.f32.mrb[10].mxu0 }
 0x4a1   :  { %vm625_vm6 = vcmp.ge.f32.partialorder %v620_v19, 0.0  ;;  %v626_v22 = vmul.f32 0.01, %v620_v19  ;;  %v943_v23 = vpop.f32.mrb[11].mxu0 }
 0x4a3   :  { %v627_v24 = vsel %vm625_vm6, %v620_v19, %v626_v22 }
 0x4a4   :  { %v628_v25 = vpack.c.bf16 %v627_v24, %v627_v24 }
 0x4a6   :  { %961 = vmatmul.mubr.bf16.vlgmr.msra.gmra.mrb[8].mxu1 %v628_v25 }
 0x579   :  { %v734_v26 = vpop.f32.mrb[8].mxu1 }
 0x57a   :  { %v735_v27 = vadd.f32 %v802_v0, %v734_v26  ;;  %v962_v28 = vpop.f32.mrb[9].mxu1 }
 0x57b   :  { %v737_v29 = vpop.f32.mrb[10].mxu1 }
 0x57c   :  { %1015 = vtanh.f32 %v735_v27  ;;  %v963_v30 = vpop.f32.mrb[11].mxu1 }
 0x586   :  { %v1016_v31 = vpop.eup %1015 }
 0x587   :  { %v741_v32 = vmul.f32 0.7, %v1016_v31 }
 0x589   :  { %v742_v33 = vadd.f32 0.5, %v741_v32 }
 0x58b   :  { %743 = vst [vmem:[#allocation11] sm:$0xff] %v742_v33 }
 0x58c   :  { %1138 = shalt.err (!%p1135_p2)
}
 0x58d   :  { %s1139_s0 = scalar_lea.hbm %s1381_s9, 128 }
 0x58e   :  { %p1140_p3 = scmp.ne.s32.totalorder %s1381_s9, %s1139_s0  ;;  %p1143_p4 = scmp.lt.u32.totalorder %s1139_s0, %s1381_s9 }
 0x590   :  { %p1145_p5 = pnand %p1143_p4, %p1140_p3 }
 0x592   :  { %1148 = shalt.err (!%p1145_p5)
}
 0x593   :  { %753 = dma.vmem_to_hbm [thread:$0]  %s751_s10, 128, %s1381_s9, [#allocation4]  }
 0x594   :  { %1155 = dma.done.wait [#allocation4], 128  }
 0x595   :  { %1156 = vsyncadd [#allocation4], 4294967168 }
 0x596   :  { %757 = vsyncpa [#allocation3], 1 }
 0x597   :  { %758 = vsyncpa [#allocation6], 1 }
 0x598   :  { %759 = vsyncpa [#allocation9], 1 }
 0x599   :  { %760 = vsyncpa [#allocation4], 1 }

</bundles_post_ra>
